<compile_context>
chip_gen: v7x
topology: tpu7x:2x2x1
jax: 0.10.0
libtpu: 0.0.40
codegen_flags: <defaults>
</compile_context>

<pallas_src>
import functools

import jax
import jax.numpy as jnp
import numpy as np
from jax import lax
from jax.experimental import pallas as pl
from jax.experimental.pallas import tpu as pltpu


def _residual_block_kernel(x_ref, w1_ref, b1_ref, w2_ref, b2_ref, out_ref,
                           *, width):
    """Grid = (batch_blocks,).  One whole image (bb of them) per step.

    x_ref:   (bb, Cin, H*W)   f32   flattened NCHW image(s)
    w1_ref:  (9, Cout, Cin)   f32   conv1 weights (BN folded), per-tap packed
    b1_ref:  (Cout, 1)        f32   conv1 bias (BN folded)
    w2_ref:  (9, Cout, Cout)  f32   conv2 weights (BN folded), per-tap packed
    b2_ref:  (Cout, 1)        f32   conv2 bias (BN folded)
    out_ref: (bb, Cout, H*W)  bf16  (lane-dense minor dim = H*W)
    """
    bb, cin, p = x_ref.shape
    cout = out_ref.shape[1]
    f32 = jnp.float32
    w = width

    # Column-edge masks (the flat row-major layout has no column padding, so
    # dx=-1 taps leak the previous row's last column at w==0 and dx=+1 taps
    # leak the next row's first column at w==W-1).  Hoisted: built once.
    col = lax.broadcasted_iota(jnp.int32, (1, p), 1) % w
    not_left = (col != 0).astype(f32)        # zero out w == 0     (dx = -1)
    not_right = (col != w - 1).astype(f32)   # zero out w == W - 1 (dx = +1)

    w1 = w1_ref[...]
    w2 = w2_ref[...]
    bias1 = b1_ref[...]
    bias2 = b2_ref[...]

    def conv3x3(act, wts, bias):
        """act: (c, H*W) f32 flat row-major image; wts: (9, Cout, c)."""
        c = act.shape[0]
        zrow = jnp.zeros((c, w + 1), f32)
        # Row-padded flat image as a value: [W+1 zeros | image | W+1 zeros].
        buf = jnp.concatenate([zrow, act, zrow], axis=1)   # (c, H*W + 2W + 2)
        acc = jnp.zeros((cout, p), f32)
        for kh in range(3):
            for kw in range(3):
                s = kh * w + kw
                tap = buf[:, s:s + p]                      # (c, H*W)
                if kw == 0:
                    tap = tap * not_left
                elif kw == 2:
                    tap = tap * not_right
                # Transposed matmul: lanes (N = H*W = 256) carry spatial
                # positions; Cout=4 only wastes MXU rows, not columns.
                acc = acc + jnp.dot(wts[kh * 3 + kw], tap,
                                    preferred_element_type=f32)
        return acc + bias

    for b in range(bb):                                    # bb is small (<= 4)
        x = x_ref[b].astype(f32)                           # (cin, H*W), f32
        y1 = jnp.maximum(conv3x3(x, w1, bias1), 0.0)       # conv1 + BN + ReLU
        y2 = conv3x3(y1, w2, bias2)                        # conv2 + BN
        out_ref[b] = jnp.maximum(y2 + x, 0.0).astype(out_ref.dtype)  # +res,ReLU


def _fold_bn(w, b, gamma, beta, mean, var, eps=1e-5):
    """Fold eval-mode BatchNorm into conv weight/bias. w: (Cout, Cin, 3, 3)."""
    scale = gamma / jnp.sqrt(var + eps)
    w_f = w * scale[:, None, None, None]
    b_f = (b - mean) * scale + beta
    return w_f, b_f


def _pack_taps(w):
    """(Cout, Cin, 3, 3) -> (9, Cout, Cin); tap index t = kh*3 + kw."""
    cout, cin = w.shape[0], w.shape[1]
    return jnp.transpose(w, (2, 3, 0, 1)).reshape(9, cout, cin).astype(jnp.float32)


def _pick_batch_block(n, per_image_bytes):
    """Images per grid step.  Fold small batches to amortize the ~0.35us/step
    overhead, but keep >= 2 grid steps when n >= 2 so v7x megacore can shard
    the batch axis, and keep the per-step block within a small VMEM budget."""
    budget = 8 * 1024 * 1024
    cap = max(1, min(4, budget // max(per_image_bytes, 1)))
    bb = min(n, cap)
    if n >= 2:
        bb = min(bb, n // 2)
    bb = max(bb, 1)
    while n % bb:
        bb -= 1
    return bb


def inconv_forward(x_nchw, params, out_dtype=jnp.bfloat16):
    w1, b1, g1, be1, m1, v1, w2, b2, g2, be2, m2, v2 = params
    cout, cin = w1.shape[0], w1.shape[1]
    assert cin == cout, "ResidualBlock requires in_ch == out_ch for the residual add"

    n, c, h, w = x_nchw.shape
    assert c == cin
    p = h * w

    w1f, b1f = _fold_bn(w1, b1, g1, be1, m1, v1)
    w2f, b2f = _fold_bn(w2, b2, g2, be2, m2, v2)
    w1p = _pack_taps(w1f)                                  # (9, Cout, Cin) f32
    w2p = _pack_taps(w2f)                                  # (9, Cout, Cout) f32
    b1k = b1f.reshape(cout, 1).astype(jnp.float32)
    b2k = b2f.reshape(cout, 1).astype(jnp.float32)

    # Free reshape only: stays NCHW, f32 (no transpose / cast HBM passes).
    x = x_nchw.reshape(n, cin, p).astype(jnp.float32)

    out_bytes = jnp.dtype(out_dtype).itemsize
    per_image_bytes = 2 * p * (cin * 4 + cout * out_bytes)     # double-buffered
    bb = _pick_batch_block(n, per_image_bytes)
    grid = (n // bb,)

    kernel = functools.partial(_residual_block_kernel, width=w)

    out = pl.pallas_call(
        kernel,
        out_shape=jax.ShapeDtypeStruct((n, cout, p), out_dtype),
        grid_spec=pltpu.PrefetchScalarGridSpec(
            num_scalar_prefetch=0,
            grid=grid,
            in_specs=[
                pl.BlockSpec((bb, cin, p), lambda i: (i, 0, 0)),
                pl.BlockSpec((9, cout, cin), lambda i: (0, 0, 0)),
                pl.BlockSpec((cout, 1), lambda i: (0, 0)),
                pl.BlockSpec((9, cout, cout), lambda i: (0, 0, 0)),
                pl.BlockSpec((cout, 1), lambda i: (0, 0)),
            ],
            # Lane-dense output: minor dim is H*W (= 256), stored as bf16.
            out_specs=pl.BlockSpec((bb, cout, p), lambda i: (i, 0, 0)),
        ),
        compiler_params=pltpu.CompilerParams(
            # Batch-only grid: on v7x megacore each core DMAs only its images.
            dimension_semantics=("parallel",),
            vmem_limit_bytes=32 * 1024 * 1024,   # per-step use is a few KB
        ),
    )(x, w1p, b1k, w2p, b2k)

    return out.reshape(n, cout, h, w)            # free reshape, still NCHW


def _reference_forward(x_nchw, params):
    """Pure-JAX f32 reference (lax.conv) mirroring the PyTorch eval-mode forward."""
    w1, b1, g1, be1, m1, v1, w2, b2, g2, be2, m2, v2 = params
    eps = 1e-5

    def conv(x, w, b):
        y = lax.conv_general_dilated(
            x, w, window_strides=(1, 1), padding=((1, 1), (1, 1)),
            dimension_numbers=("NCHW", "OIHW", "NCHW"))
        return y + b[None, :, None, None]

    def bn(x, g, be, m, v):
        return (x - m[None, :, None, None]) / jnp.sqrt(v[None, :, None, None] + eps) \
               * g[None, :, None, None] + be[None, :, None, None]

    res = x_nchw
    y = jax.nn.relu(bn(conv(x_nchw, w1, b1), g1, be1, m1, v1))
    y = bn(conv(y, w2, b2), g2, be2, m2, v2)
    return jax.nn.relu(y + res)


def _init_params(key, in_ch, out_ch):
    ks = jax.random.split(key, 8)
    fan1 = in_ch * 9
    fan2 = out_ch * 9
    w1 = jax.random.uniform(ks[0], (out_ch, in_ch, 3, 3), jnp.float32,
                            -1.0 / np.sqrt(fan1), 1.0 / np.sqrt(fan1))
    b1 = jax.random.uniform(ks[1], (out_ch,), jnp.float32,
                            -1.0 / np.sqrt(fan1), 1.0 / np.sqrt(fan1))
    w2 = jax.random.uniform(ks[2], (out_ch, out_ch, 3, 3), jnp.float32,
                            -1.0 / np.sqrt(fan2), 1.0 / np.sqrt(fan2))
    b2 = jax.random.uniform(ks[3], (out_ch,), jnp.float32,
                            -1.0 / np.sqrt(fan2), 1.0 / np.sqrt(fan2))
    g1 = jnp.ones((out_ch,), jnp.float32)
    be1 = jnp.zeros((out_ch,), jnp.float32)
    m1 = 0.1 * jax.random.normal(ks[4], (out_ch,), jnp.float32)
    v1 = jnp.abs(jax.random.normal(ks[5], (out_ch,), jnp.float32)) + 0.5
    g2 = jnp.ones((out_ch,), jnp.float32)
    be2 = jnp.zeros((out_ch,), jnp.float32)
    m2 = 0.1 * jax.random.normal(ks[6], (out_ch,), jnp.float32)
    v2 = jnp.abs(jax.random.normal(ks[7], (out_ch,), jnp.float32)) + 0.5
    return (w1, b1, g1, be1, m1, v1, w2, b2, g2, be2, m2, v2)


if __name__ == "__main__":
    key = jax.random.PRNGKey(0)
    k_x, k_p = jax.random.split(key)

    N, C, H, W = 2, 4, 16, 16          # in_ch == out_ch == 4
    x = jax.random.normal(k_x, (N, C, H, W), jnp.float32)
    params = _init_params(k_p, C, C)

    out = jax.block_until_ready(jax.jit(inconv_forward)(x, params))
    ref = jax.block_until_ready(_reference_forward(x, params))

    assert out.shape == (N, C, H, W)
    # All conv / residual math is f32 in-kernel; only the final store is bf16,
    # so the tolerance only needs to cover one bf16 rounding of the output.
    np.testing.assert_allclose(np.asarray(out.astype(jnp.float32)),
                               np.asarray(ref), rtol=2e-2, atol=2e-2)
    print("KERNEL_OK")
</pallas_src>

<mosaic_0001>
module attributes {stable_mosaic.version = 11 : i64} {
  func.func @_residual_block_kernel(%arg0: i32, %arg1: memref<1x4x256xf32, #tpu.memory_space<vmem>>, %arg2: memref<9x4x4xf32, #tpu.memory_space<vmem>>, %arg3: memref<4x1xf32, #tpu.memory_space<vmem>>, %arg4: memref<9x4x4xf32, #tpu.memory_space<vmem>>, %arg5: memref<4x1xf32, #tpu.memory_space<vmem>>, %arg6: memref<1x4x256xbf16, #tpu.memory_space<vmem>>) attributes {dimension_semantics = [#tpu.dimension_semantics<parallel>], iteration_bounds = array<i64: 2>, scalar_prefetch = 0 : i64, scratch_operands = 0 : i64, tpu.core_type = #tpu.core_type<tc>, window_params = [{transform_indices = @transform_0, window_bounds = array<i64: 1, 4, 256>}, {pipeline_mode = #tpu.pipeline_mode<synchronous>, transform_indices = @transform_1, window_bounds = array<i64: 9, 4, 4>}, {pipeline_mode = #tpu.pipeline_mode<synchronous>, transform_indices = @transform_2, window_bounds = array<i64: 4, 1>}, {pipeline_mode = #tpu.pipeline_mode<synchronous>, transform_indices = @transform_3, window_bounds = array<i64: 9, 4, 4>}, {pipeline_mode = #tpu.pipeline_mode<synchronous>, transform_indices = @transform_4, window_bounds = array<i64: 4, 1>}, {transform_indices = @transform_5, window_bounds = array<i64: 1, 4, 256>}]} {
    %0 = tpu.iota {dimensions = array<i32: 1>} : vector<1x256xi32>
    %c16_i32 = arith.constant 16 : i32
    %c0_i32 = arith.constant 0 : i32
    %1 = arith.cmpi eq, %c16_i32, %c0_i32 : i32
    %c1_i32 = arith.constant 1 : i32
    %2 = arith.select %1, %c1_i32, %c16_i32 : i32
    %3 = vector.broadcast %2 : i32 to vector<1x256xi32>
    %4 = arith.remsi %0, %3 : vector<1x256xi32>
    %c0_i32_0 = arith.constant 0 : i32
    %5 = vector.broadcast %c0_i32_0 : i32 to vector<1x256xi32>
    %6 = arith.cmpi ne, %4, %5 : vector<1x256xi32>
    %c0_i32_1 = arith.constant 0 : i32
    %7 = vector.broadcast %c0_i32_1 : i32 to vector<1x256xi32>
    %8 = arith.cmpi slt, %4, %7 : vector<1x256xi32>
    %c0_i32_2 = arith.constant 0 : i32
    %9 = arith.cmpi slt, %2, %c0_i32_2 : i32
    %10 = vector.broadcast %9 : i1 to vector<1x256xi1>
    %11 = vector.broadcast %10 : vector<1x256xi1> to vector<1x256xi1>
    %12 = arith.xori %8, %11 : vector<1x256xi1>
    %13 = arith.andi %12, %6 : vector<1x256xi1>
    %14 = vector.broadcast %2 : i32 to vector<1x256xi32>
    %15 = arith.addi %4, %14 : vector<1x256xi32>
    %16 = arith.select %13, %15, %4 : vector<1x256xi1>, vector<1x256xi32>
    %c0_i32_3 = arith.constant 0 : i32
    %17 = vector.broadcast %c0_i32_3 : i32 to vector<1x256xi32>
    %18 = arith.cmpi ne, %16, %17 : vector<1x256xi32>
    %19 = arith.extui %18 : vector<1x256xi1> to vector<1x256xi32>
    %20 = arith.sitofp %19 : vector<1x256xi32> to vector<1x256xf32>
    %c15_i32 = arith.constant 15 : i32
    %21 = vector.broadcast %c15_i32 : i32 to vector<1x256xi32>
    %22 = arith.cmpi ne, %16, %21 : vector<1x256xi32>
    %23 = arith.extui %22 : vector<1x256xi1> to vector<1x256xi32>
    %24 = arith.sitofp %23 : vector<1x256xi32> to vector<1x256xf32>
    %c0 = arith.constant 0 : index
    %c0_4 = arith.constant 0 : index
    %c0_5 = arith.constant 0 : index
    %25 = vector.load %arg2[%c0, %c0_4, %c0_5] : memref<9x4x4xf32, #tpu.memory_space<vmem>>, vector<9x4x4xf32>
    %c0_6 = arith.constant 0 : index
    %c0_7 = arith.constant 0 : index
    %c0_8 = arith.constant 0 : index
    %26 = vector.load %arg4[%c0_6, %c0_7, %c0_8] : memref<9x4x4xf32, #tpu.memory_space<vmem>>, vector<9x4x4xf32>
    %c0_9 = arith.constant 0 : index
    %c0_10 = arith.constant 0 : index
    %27 = vector.load %arg3[%c0_9, %c0_10] : memref<4x1xf32, #tpu.memory_space<vmem>>, vector<4x1xf32>
    %c0_11 = arith.constant 0 : index
    %c0_12 = arith.constant 0 : index
    %28 = vector.load %arg5[%c0_11, %c0_12] : memref<4x1xf32, #tpu.memory_space<vmem>>, vector<4x1xf32>
    %c0_13 = arith.constant 0 : index
    %c0_14 = arith.constant 0 : index
    %c0_15 = arith.constant 0 : index
    %29 = vector.load %arg1[%c0_13, %c0_14, %c0_15] : memref<1x4x256xf32, #tpu.memory_space<vmem>>, vector<1x4x256xf32>
    %30 = vector.shape_cast %29 : vector<1x4x256xf32> to vector<4x256xf32>
    %cst = arith.constant 0.000000e+00 : f32
    %31 = vector.broadcast %cst : f32 to vector<4x17xf32>
    %32 = tpu.concatenate %31, %30, %31 in 1 : vector<4x17xf32>, vector<4x256xf32>, vector<4x17xf32> -> vector<4x290xf32>
    %cst_16 = arith.constant 0.000000e+00 : f32
    %33 = vector.broadcast %cst_16 : f32 to vector<4x256xf32>
    %34 = vector.extract_strided_slice %32 {offsets = [0, 0], sizes = [4, 256], strides = [1, 1]} : vector<4x290xf32> to vector<4x256xf32>
    %35 = vector.broadcast %20 : vector<1x256xf32> to vector<4x256xf32>
    %36 = arith.mulf %34, %35 : vector<4x256xf32>
    %37 = vector.extract_strided_slice %25 {offsets = [0, 0, 0], sizes = [1, 4, 4], strides = [1, 1, 1]} : vector<9x4x4xf32> to vector<1x4x4xf32>
    %38 = vector.shape_cast %37 : vector<1x4x4xf32> to vector<4x4xf32>
    %cst_17 = arith.constant dense<0.000000e+00> : vector<4x256xf32>
    %39 = tpu.matmul %38, %36, %cst_17 {dimension_numbers = #tpu.dot_dimension_numbers<[1], [0], [0], [1], [0, 0, 1, 1], [], []>} : vector<4x4xf32>, vector<4x256xf32>, vector<4x256xf32> -> vector<4x256xf32>
    %40 = arith.addf %33, %39 : vector<4x256xf32>
    %41 = vector.extract_strided_slice %32 {offsets = [0, 1], sizes = [4, 256], strides = [1, 1]} : vector<4x290xf32> to vector<4x256xf32>
    %42 = vector.extract_strided_slice %25 {offsets = [1, 0, 0], sizes = [1, 4, 4], strides = [1, 1, 1]} : vector<9x4x4xf32> to vector<1x4x4xf32>
    %43 = vector.shape_cast %42 : vector<1x4x4xf32> to vector<4x4xf32>
    %cst_18 = arith.constant dense<0.000000e+00> : vector<4x256xf32>
    %44 = tpu.matmul %43, %41, %cst_18 {dimension_numbers = #tpu.dot_dimension_numbers<[1], [0], [0], [1], [0, 0, 1, 1], [], []>} : vector<4x4xf32>, vector<4x256xf32>, vector<4x256xf32> -> vector<4x256xf32>
    %45 = arith.addf %40, %44 : vector<4x256xf32>
    %46 = vector.extract_strided_slice %32 {offsets = [0, 2], sizes = [4, 256], strides = [1, 1]} : vector<4x290xf32> to vector<4x256xf32>
    %47 = vector.broadcast %24 : vector<1x256xf32> to vector<4x256xf32>
    %48 = arith.mulf %46, %47 : vector<4x256xf32>
    %49 = vector.extract_strided_slice %25 {offsets = [2, 0, 0], sizes = [1, 4, 4], strides = [1, 1, 1]} : vector<9x4x4xf32> to vector<1x4x4xf32>
    %50 = vector.shape_cast %49 : vector<1x4x4xf32> to vector<4x4xf32>
    %cst_19 = arith.constant dense<0.000000e+00> : vector<4x256xf32>
    %51 = tpu.matmul %50, %48, %cst_19 {dimension_numbers = #tpu.dot_dimension_numbers<[1], [0], [0], [1], [0, 0, 1, 1], [], []>} : vector<4x4xf32>, vector<4x256xf32>, vector<4x256xf32> -> vector<4x256xf32>
    %52 = arith.addf %45, %51 : vector<4x256xf32>
    %53 = vector.extract_strided_slice %32 {offsets = [0, 16], sizes = [4, 256], strides = [1, 1]} : vector<4x290xf32> to vector<4x256xf32>
    %54 = vector.broadcast %20 : vector<1x256xf32> to vector<4x256xf32>
    %55 = arith.mulf %53, %54 : vector<4x256xf32>
    %56 = vector.extract_strided_slice %25 {offsets = [3, 0, 0], sizes = [1, 4, 4], strides = [1, 1, 1]} : vector<9x4x4xf32> to vector<1x4x4xf32>
    %57 = vector.shape_cast %56 : vector<1x4x4xf32> to vector<4x4xf32>
    %cst_20 = arith.constant dense<0.000000e+00> : vector<4x256xf32>
    %58 = tpu.matmul %57, %55, %cst_20 {dimension_numbers = #tpu.dot_dimension_numbers<[1], [0], [0], [1], [0, 0, 1, 1], [], []>} : vector<4x4xf32>, vector<4x256xf32>, vector<4x256xf32> -> vector<4x256xf32>
    %59 = arith.addf %52, %58 : vector<4x256xf32>
    %60 = vector.extract_strided_slice %32 {offsets = [0, 17], sizes = [4, 256], strides = [1, 1]} : vector<4x290xf32> to vector<4x256xf32>
    %61 = vector.extract_strided_slice %25 {offsets = [4, 0, 0], sizes = [1, 4, 4], strides = [1, 1, 1]} : vector<9x4x4xf32> to vector<1x4x4xf32>
    %62 = vector.shape_cast %61 : vector<1x4x4xf32> to vector<4x4xf32>
    %cst_21 = arith.constant dense<0.000000e+00> : vector<4x256xf32>
    %63 = tpu.matmul %62, %60, %cst_21 {dimension_numbers = #tpu.dot_dimension_numbers<[1], [0], [0], [1], [0, 0, 1, 1], [], []>} : vector<4x4xf32>, vector<4x256xf32>, vector<4x256xf32> -> vector<4x256xf32>
    %64 = arith.addf %59, %63 : vector<4x256xf32>
    %65 = vector.extract_strided_slice %32 {offsets = [0, 18], sizes = [4, 256], strides = [1, 1]} : vector<4x290xf32> to vector<4x256xf32>
    %66 = vector.broadcast %24 : vector<1x256xf32> to vector<4x256xf32>
    %67 = arith.mulf %65, %66 : vector<4x256xf32>
    %68 = vector.extract_strided_slice %25 {offsets = [5, 0, 0], sizes = [1, 4, 4], strides = [1, 1, 1]} : vector<9x4x4xf32> to vector<1x4x4xf32>
    %69 = vector.shape_cast %68 : vector<1x4x4xf32> to vector<4x4xf32>
    %cst_22 = arith.constant dense<0.000000e+00> : vector<4x256xf32>
    %70 = tpu.matmul %69, %67, %cst_22 {dimension_numbers = #tpu.dot_dimension_numbers<[1], [0], [0], [1], [0, 0, 1, 1], [], []>} : vector<4x4xf32>, vector<4x256xf32>, vector<4x256xf32> -> vector<4x256xf32>
    %71 = arith.addf %64, %70 : vector<4x256xf32>
    %72 = vector.extract_strided_slice %32 {offsets = [0, 32], sizes = [4, 256], strides = [1, 1]} : vector<4x290xf32> to vector<4x256xf32>
    %73 = vector.broadcast %20 : vector<1x256xf32> to vector<4x256xf32>
    %74 = arith.mulf %72, %73 : vector<4x256xf32>
    %75 = vector.extract_strided_slice %25 {offsets = [6, 0, 0], sizes = [1, 4, 4], strides = [1, 1, 1]} : vector<9x4x4xf32> to vector<1x4x4xf32>
    %76 = vector.shape_cast %75 : vector<1x4x4xf32> to vector<4x4xf32>
    %cst_23 = arith.constant dense<0.000000e+00> : vector<4x256xf32>
    %77 = tpu.matmul %76, %74, %cst_23 {dimension_numbers = #tpu.dot_dimension_numbers<[1], [0], [0], [1], [0, 0, 1, 1], [], []>} : vector<4x4xf32>, vector<4x256xf32>, vector<4x256xf32> -> vector<4x256xf32>
    %78 = arith.addf %71, %77 : vector<4x256xf32>
    %79 = vector.extract_strided_slice %32 {offsets = [0, 33], sizes = [4, 256], strides = [1, 1]} : vector<4x290xf32> to vector<4x256xf32>
    %80 = vector.extract_strided_slice %25 {offsets = [7, 0, 0], sizes = [1, 4, 4], strides = [1, 1, 1]} : vector<9x4x4xf32> to vector<1x4x4xf32>
    %81 = vector.shape_cast %80 : vector<1x4x4xf32> to vector<4x4xf32>
    %cst_24 = arith.constant dense<0.000000e+00> : vector<4x256xf32>
    %82 = tpu.matmul %81, %79, %cst_24 {dimension_numbers = #tpu.dot_dimension_numbers<[1], [0], [0], [1], [0, 0, 1, 1], [], []>} : vector<4x4xf32>, vector<4x256xf32>, vector<4x256xf32> -> vector<4x256xf32>
    %83 = arith.addf %78, %82 : vector<4x256xf32>
    %84 = vector.extract_strided_slice %32 {offsets = [0, 34], sizes = [4, 256], strides = [1, 1]} : vector<4x290xf32> to vector<4x256xf32>
    %85 = vector.broadcast %24 : vector<1x256xf32> to vector<4x256xf32>
    %86 = arith.mulf %84, %85 : vector<4x256xf32>
    %87 = vector.extract_strided_slice %25 {offsets = [8, 0, 0], sizes = [1, 4, 4], strides = [1, 1, 1]} : vector<9x4x4xf32> to vector<1x4x4xf32>
    %88 = vector.shape_cast %87 : vector<1x4x4xf32> to vector<4x4xf32>
    %cst_25 = arith.constant dense<0.000000e+00> : vector<4x256xf32>
    %89 = tpu.matmul %88, %86, %cst_25 {dimension_numbers = #tpu.dot_dimension_numbers<[1], [0], [0], [1], [0, 0, 1, 1], [], []>} : vector<4x4xf32>, vector<4x256xf32>, vector<4x256xf32> -> vector<4x256xf32>
    %90 = arith.addf %83, %89 : vector<4x256xf32>
    %91 = vector.broadcast %27 : vector<4x1xf32> to vector<4x256xf32>
    %92 = arith.addf %90, %91 : vector<4x256xf32>
    %cst_26 = arith.constant 0.000000e+00 : f32
    %93 = vector.broadcast %cst_26 : f32 to vector<4x256xf32>
    %94 = arith.maximumf %92, %93 : vector<4x256xf32>
    %cst_27 = arith.constant 0.000000e+00 : f32
    %95 = vector.broadcast %cst_27 : f32 to vector<4x17xf32>
    %96 = tpu.concatenate %95, %94, %95 in 1 : vector<4x17xf32>, vector<4x256xf32>, vector<4x17xf32> -> vector<4x290xf32>
    %cst_28 = arith.constant 0.000000e+00 : f32
    %97 = vector.broadcast %cst_28 : f32 to vector<4x256xf32>
    %98 = vector.extract_strided_slice %96 {offsets = [0, 0], sizes = [4, 256], strides = [1, 1]} : vector<4x290xf32> to vector<4x256xf32>
    %99 = vector.broadcast %20 : vector<1x256xf32> to vector<4x256xf32>
    %100 = arith.mulf %98, %99 : vector<4x256xf32>
    %101 = vector.extract_strided_slice %26 {offsets = [0, 0, 0], sizes = [1, 4, 4], strides = [1, 1, 1]} : vector<9x4x4xf32> to vector<1x4x4xf32>
    %102 = vector.shape_cast %101 : vector<1x4x4xf32> to vector<4x4xf32>
    %cst_29 = arith.constant dense<0.000000e+00> : vector<4x256xf32>
    %103 = tpu.matmul %102, %100, %cst_29 {dimension_numbers = #tpu.dot_dimension_numbers<[1], [0], [0], [1], [0, 0, 1, 1], [], []>} : vector<4x4xf32>, vector<4x256xf32>, vector<4x256xf32> -> vector<4x256xf32>
    %104 = arith.addf %97, %103 : vector<4x256xf32>
    %105 = vector.extract_strided_slice %96 {offsets = [0, 1], sizes = [4, 256], strides = [1, 1]} : vector<4x290xf32> to vector<4x256xf32>
    %106 = vector.extract_strided_slice %26 {offsets = [1, 0, 0], sizes = [1, 4, 4], strides = [1, 1, 1]} : vector<9x4x4xf32> to vector<1x4x4xf32>
    %107 = vector.shape_cast %106 : vector<1x4x4xf32> to vector<4x4xf32>
    %cst_30 = arith.constant dense<0.000000e+00> : vector<4x256xf32>
    %108 = tpu.matmul %107, %105, %cst_30 {dimension_numbers = #tpu.dot_dimension_numbers<[1], [0], [0], [1], [0, 0, 1, 1], [], []>} : vector<4x4xf32>, vector<4x256xf32>, vector<4x256xf32> -> vector<4x256xf32>
    %109 = arith.addf %104, %108 : vector<4x256xf32>
    %110 = vector.extract_strided_slice %96 {offsets = [0, 2], sizes = [4, 256], strides = [1, 1]} : vector<4x290xf32> to vector<4x256xf32>
    %111 = vector.broadcast %24 : vector<1x256xf32> to vector<4x256xf32>
    %112 = arith.mulf %110, %111 : vector<4x256xf32>
    %113 = vector.extract_strided_slice %26 {offsets = [2, 0, 0], sizes = [1, 4, 4], strides = [1, 1, 1]} : vector<9x4x4xf32> to vector<1x4x4xf32>
    %114 = vector.shape_cast %113 : vector<1x4x4xf32> to vector<4x4xf32>
    %cst_31 = arith.constant dense<0.000000e+00> : vector<4x256xf32>
    %115 = tpu.matmul %114, %112, %cst_31 {dimension_numbers = #tpu.dot_dimension_numbers<[1], [0], [0], [1], [0, 0, 1, 1], [], []>} : vector<4x4xf32>, vector<4x256xf32>, vector<4x256xf32> -> vector<4x256xf32>
    %116 = arith.addf %109, %115 : vector<4x256xf32>
    %117 = vector.extract_strided_slice %96 {offsets = [0, 16], sizes = [4, 256], strides = [1, 1]} : vector<4x290xf32> to vector<4x256xf32>
    %118 = vector.broadcast %20 : vector<1x256xf32> to vector<4x256xf32>
    %119 = arith.mulf %117, %118 : vector<4x256xf32>
    %120 = vector.extract_strided_slice %26 {offsets = [3, 0, 0], sizes = [1, 4, 4], strides = [1, 1, 1]} : vector<9x4x4xf32> to vector<1x4x4xf32>
    %121 = vector.shape_cast %120 : vector<1x4x4xf32> to vector<4x4xf32>
    %cst_32 = arith.constant dense<0.000000e+00> : vector<4x256xf32>
    %122 = tpu.matmul %121, %119, %cst_32 {dimension_numbers = #tpu.dot_dimension_numbers<[1], [0], [0], [1], [0, 0, 1, 1], [], []>} : vector<4x4xf32>, vector<4x256xf32>, vector<4x256xf32> -> vector<4x256xf32>
    %123 = arith.addf %116, %122 : vector<4x256xf32>
    %124 = vector.extract_strided_slice %96 {offsets = [0, 17], sizes = [4, 256], strides = [1, 1]} : vector<4x290xf32> to vector<4x256xf32>
    %125 = vector.extract_strided_slice %26 {offsets = [4, 0, 0], sizes = [1, 4, 4], strides = [1, 1, 1]} : vector<9x4x4xf32> to vector<1x4x4xf32>
    %126 = vector.shape_cast %125 : vector<1x4x4xf32> to vector<4x4xf32>
    %cst_33 = arith.constant dense<0.000000e+00> : vector<4x256xf32>
    %127 = tpu.matmul %126, %124, %cst_33 {dimension_numbers = #tpu.dot_dimension_numbers<[1], [0], [0], [1], [0, 0, 1, 1], [], []>} : vector<4x4xf32>, vector<4x256xf32>, vector<4x256xf32> -> vector<4x256xf32>
    %128 = arith.addf %123, %127 : vector<4x256xf32>
    %129 = vector.extract_strided_slice %96 {offsets = [0, 18], sizes = [4, 256], strides = [1, 1]} : vector<4x290xf32> to vector<4x256xf32>
    %130 = vector.broadcast %24 : vector<1x256xf32> to vector<4x256xf32>
    %131 = arith.mulf %129, %130 : vector<4x256xf32>
    %132 = vector.extract_strided_slice %26 {offsets = [5, 0, 0], sizes = [1, 4, 4], strides = [1, 1, 1]} : vector<9x4x4xf32> to vector<1x4x4xf32>
    %133 = vector.shape_cast %132 : vector<1x4x4xf32> to vector<4x4xf32>
    %cst_34 = arith.constant dense<0.000000e+00> : vector<4x256xf32>
    %134 = tpu.matmul %133, %131, %cst_34 {dimension_numbers = #tpu.dot_dimension_numbers<[1], [0], [0], [1], [0, 0, 1, 1], [], []>} : vector<4x4xf32>, vector<4x256xf32>, vector<4x256xf32> -> vector<4x256xf32>
    %135 = arith.addf %128, %134 : vector<4x256xf32>
    %136 = vector.extract_strided_slice %96 {offsets = [0, 32], sizes = [4, 256], strides = [1, 1]} : vector<4x290xf32> to vector<4x256xf32>
    %137 = vector.broadcast %20 : vector<1x256xf32> to vector<4x256xf32>
    %138 = arith.mulf %136, %137 : vector<4x256xf32>
    %139 = vector.extract_strided_slice %26 {offsets = [6, 0, 0], sizes = [1, 4, 4], strides = [1, 1, 1]} : vector<9x4x4xf32> to vector<1x4x4xf32>
    %140 = vector.shape_cast %139 : vector<1x4x4xf32> to vector<4x4xf32>
    %cst_35 = arith.constant dense<0.000000e+00> : vector<4x256xf32>
    %141 = tpu.matmul %140, %138, %cst_35 {dimension_numbers = #tpu.dot_dimension_numbers<[1], [0], [0], [1], [0, 0, 1, 1], [], []>} : vector<4x4xf32>, vector<4x256xf32>, vector<4x256xf32> -> vector<4x256xf32>
    %142 = arith.addf %135, %141 : vector<4x256xf32>
    %143 = vector.extract_strided_slice %96 {offsets = [0, 33], sizes = [4, 256], strides = [1, 1]} : vector<4x290xf32> to vector<4x256xf32>
    %144 = vector.extract_strided_slice %26 {offsets = [7, 0, 0], sizes = [1, 4, 4], strides = [1, 1, 1]} : vector<9x4x4xf32> to vector<1x4x4xf32>
    %145 = vector.shape_cast %144 : vector<1x4x4xf32> to vector<4x4xf32>
    %cst_36 = arith.constant dense<0.000000e+00> : vector<4x256xf32>
    %146 = tpu.matmul %145, %143, %cst_36 {dimension_numbers = #tpu.dot_dimension_numbers<[1], [0], [0], [1], [0, 0, 1, 1], [], []>} : vector<4x4xf32>, vector<4x256xf32>, vector<4x256xf32> -> vector<4x256xf32>
    %147 = arith.addf %142, %146 : vector<4x256xf32>
    %148 = vector.extract_strided_slice %96 {offsets = [0, 34], sizes = [4, 256], strides = [1, 1]} : vector<4x290xf32> to vector<4x256xf32>
    %149 = vector.broadcast %24 : vector<1x256xf32> to vector<4x256xf32>
    %150 = arith.mulf %148, %149 : vector<4x256xf32>
    %151 = vector.extract_strided_slice %26 {offsets = [8, 0, 0], sizes = [1, 4, 4], strides = [1, 1, 1]} : vector<9x4x4xf32> to vector<1x4x4xf32>
    %152 = vector.shape_cast %151 : vector<1x4x4xf32> to vector<4x4xf32>
    %cst_37 = arith.constant dense<0.000000e+00> : vector<4x256xf32>
    %153 = tpu.matmul %152, %150, %cst_37 {dimension_numbers = #tpu.dot_dimension_numbers<[1], [0], [0], [1], [0, 0, 1, 1], [], []>} : vector<4x4xf32>, vector<4x256xf32>, vector<4x256xf32> -> vector<4x256xf32>
    %154 = arith.addf %147, %153 : vector<4x256xf32>
    %155 = vector.broadcast %28 : vector<4x1xf32> to vector<4x256xf32>
    %156 = arith.addf %154, %155 : vector<4x256xf32>
    %157 = arith.addf %156, %30 : vector<4x256xf32>
    %cst_38 = arith.constant 0.000000e+00 : f32
    %158 = vector.broadcast %cst_38 : f32 to vector<4x256xf32>
    %159 = arith.maximumf %157, %158 : vector<4x256xf32>
    %160 = arith.truncf %159 : vector<4x256xf32> to vector<4x256xbf16>
    %c0_39 = arith.constant 0 : index
    %c0_40 = arith.constant 0 : index
    %c0_41 = arith.constant 0 : index
    %161 = vector.load %arg6[%c0_39, %c0_40, %c0_41] : memref<1x4x256xbf16, #tpu.memory_space<vmem>>, vector<1x4x256xbf16>
    %162 = vector.shape_cast %161 : vector<1x4x256xbf16> to vector<4x256xbf16>
    %163 = vector.shape_cast %160 : vector<4x256xbf16> to vector<1x4x256xbf16>
    tpu.vector_store %arg6[%c0_39, %c0_40, %c0_41], %163 {strides = array<i32>} : memref<1x4x256xbf16, #tpu.memory_space<vmem>>, vector<1x4x256xbf16>,
    return
  }
  func.func @transform_0(%arg0: i32) -> (i32, i32, i32) {
    %c0_i32 = arith.constant 0 : i32
    %c0_i32_0 = arith.constant 0 : i32
    %c0_i32_1 = arith.constant 0 : i32
    return %arg0, %c0_i32, %c0_i32_0 : i32, i32, i32
  }
  func.func @transform_1(%arg0: i32) -> (i32, i32, i32) {
    %c0_i32 = arith.constant 0 : i32
    %c0_i32_0 = arith.constant 0 : i32
    %c0_i32_1 = arith.constant 0 : i32
    %c0_i32_2 = arith.constant 0 : i32
    return %c0_i32, %c0_i32_0, %c0_i32_1 : i32, i32, i32
  }
  func.func @transform_2(%arg0: i32) -> (i32, i32) {
    %c0_i32 = arith.constant 0 : i32
    %c0_i32_0 = arith.constant 0 : i32
    %c0_i32_1 = arith.constant 0 : i32
    return %c0_i32, %c0_i32_0 : i32, i32
  }
  func.func @transform_3(%arg0: i32) -> (i32, i32, i32) {
    %c0_i32 = arith.constant 0 : i32
    %c0_i32_0 = arith.constant 0 : i32
    %c0_i32_1 = arith.constant 0 : i32
    %c0_i32_2 = arith.constant 0 : i32
    return %c0_i32, %c0_i32_0, %c0_i32_1 : i32, i32, i32
  }
  func.func @transform_4(%arg0: i32) -> (i32, i32) {
    %c0_i32 = arith.constant 0 : i32
    %c0_i32_0 = arith.constant 0 : i32
    %c0_i32_1 = arith.constant 0 : i32
    return %c0_i32, %c0_i32_0 : i32, i32
  }
  func.func @transform_5(%arg0: i32) -> (i32, i32, i32) {
    %c0_i32 = arith.constant 0 : i32
    %c0_i32_0 = arith.constant 0 : i32
    %c0_i32_1 = arith.constant 0 : i32
    return %arg0, %c0_i32, %c0_i32_0 : i32, i32, i32
  }
}

</mosaic_0001>

<bundles_post_ra>
// kernel: inconv_forward.1
= control target key start
LH: loop header
LB: loop body
LE: loop exit
PB: predicated region body
PF: predicated region fallthrough
CT: control target
= control target key end

     0   :  { %s2302_s18 = smov 0   ;;  %s2671_s0 = inlined_call_operand.vmem [shape: f32[2,4,256], index: 0, kind: input, shape index: {}]   ;;  %s2672_s1 = inlined_call_operand.vmem [shape: f32[9,4,4], index: 1, kind: input, shape index: {}]   ;;  %s2673_s2 = inlined_call_operand.vmem [shape: f32[4,1], index: 2, kind: input, shape index: {}]   ;;  %s2674_s3 = inlined_call_operand.vmem [shape: f32[9,4,4], index: 3, kind: input, shape index: {}]   ;;  %s2675_s4 = inlined_call_operand.vmem [shape: f32[4,1], index: 4, kind: input, shape index: {}]   ;;  %s2676_s5 = inlined_call_operand.vmem [shape: bf16[2,4,256], index: 5, kind: output, shape index: {}]  }
   0x1 LB: > { %s2091_s19 = sadd.s32 4294967295, %s2254_s18   ;;  %p2095_p0 = scmp.ge.s32.totalorder %s2254_s18, 1  ;;  %s2254_s18 = sphi %s2302_s18, %s15_s18  }
   0x2   : > { %p187_p1 = scmp.lt.s32.totalorder %s2254_s18, 3 }
   0x4   : > { %p188_p2 = pnand %p2095_p0, %p187_p1 }
   0x5   : > { %p215_p3 = scmp.lt.s32.totalorder (!%p188_p2), %s2091_s19, 1  ;;  %v225_v0 = vlaneseq (!%p188_p2)  ;;  %v2256_v1 = vmov (!%p188_p2), 0.0   ;;  %s2257_s24 = smov (!%p188_p2), 17   ;;  %vm291_vm4 = vcmask (!%p188_p2), 138240   ;;  %vm477_vm5 = vcmask (!%p188_p2), 15360  }
   0x6   : > { %191 = sbr.rel (%p188_p2) target bundleno = 1122 (0x462), region = 40  ;;  %384 = vmatprep.mubr.f32.mxu0 (!%p188_p2), %v2256_v1  ;;  %1277 = vmatprep.mubr.f32.mxu1 (!%p188_p2), %v2256_v1  ;;  %s2258_s25 = smov (!%p188_p2), 2   ;;  %vm583_vm6 = vcmask (!%p188_p2), 130048   ;;  %vm776_vm7 = vcmask (!%p188_p2), 146432   ;;  %vm880_vm8 = vcmask (!%p188_p2), 261120   ;;  %vm308_vm9 = vcmask (!%p188_p2), 1039360  }
   0x7   : > { %v226_v2 = vand.u32 (!%p188_p2), 127, %v225_v0  ;;  %s2259_s26 = smov (!%p188_p2), 18   ;;  %s2260_s27 = smov (!%p188_p2), 16   ;;  %vm315_vm10 = vcmask (!%p188_p2), 1043456   ;;  %v265_v52 = vld [vmem:[%s2672_s1 + $0x4] sm:$0xf] (!%p188_p2) }
   0x8   : > { %s2261_s28 = smov (!%p188_p2), 32   ;;  %s2262_s29 = smov (!%p188_p2), 127   ;;  %vm311_vm11 = vcmask (!%p188_p2), 31744   ;;  %vm1073_vm12 = vcmask (!%p188_p2), 277504   ;;  %v2270_v53 = vmov (!%p188_p2), 0   ;;  %vm494_vm13 = vcmask (!%p188_p2), 1031168  }
   0x9   : > { %v227_v3 = vadd.s32 (!%p188_p2), 128, %v226_v2  ;;  %v232_v4 = vand.u32 (!%p188_p2), 15, %v226_v2  ;;  %s2263_s30 = smov (!%p188_p2), 34   ;;  %s2264_s6 = smov (!%p188_p2), 126   ;;  %2245 = vset.pattern.permute.xlu1 (!%p188_p2), %v2270_v53  ;;  %2246 = vset.pattern.permute.xlu0 (!%p188_p2), %v2270_v53  ;;  %v282_v2 = vld [vmem:[%s2673_s2] sm:$0xf] (!%p188_p2) }
   0xa   : > { %s2265_s7 = smov (!%p188_p2), 112   ;;  %s2266_s8 = smov (!%p188_p2), 111   ;;  %vm600_vm14 = vcmask (!%p188_p2), 916480   ;;  %vm689_vm15 = vcmask (!%p188_p2), 908288   ;;  %v271_v53 = vld [vmem:[%s2672_s1 + $0x1c] sm:$0xf] (!%p188_p2) }
   0xb   : > { %v239_v6 = vand.u32 (!%p188_p2), 15, %v227_v3  ;;  %vm252_vm0 = vcmp.ne.s32.totalorder (!%p188_p2), %v232_v4, 0  ;;  %vm258_vm1 = vcmp.ne.s32.totalorder (!%p188_p2), %v232_v4, 15  ;;  %s2267_s9 = smov (!%p188_p2), 110   ;;  %s2268_s10 = smov (!%p188_p2), 96  }
   0xc   : > { %v2102_v8 = vsel (!%p188_p2), %vm258_vm1, 1.0, %v2256_v1  ;;  %v2329_v10 = vsel (!%p188_p2), %vm252_vm0, 1.0, %v2256_v1  ;;  %s2269_s11 = smov (!%p188_p2), 95   ;;  %s2271_s14 = smov (!%p188_p2), 94   ;;  %vm793_vm0 = vcmask (!%p188_p2), 900096   ;;  %vm897_vm1 = vcmask (!%p188_p2), 785408  }
   0xd   : > { %s2678_s19 = smov (!%p215_p3, %s2091_s19), 1  ;;  %vm259_vm2 = vcmp.ne.s32.totalorder %v239_v6, 15  ;;  %vm253_vm3 = vcmp.ne.s32.totalorder %v239_v6, 0 }
   0xe   : > { %s2162_s20 = sshll.u32 %s2678_s19, 3  ;;  %v2103_v9 = vsel %vm259_vm2, 1.0, %v2256_v1  ;;  %v2332_v11 = vsel %vm253_vm3, 1.0, %v2256_v1  ;;  %vm986_vm2 = vcmask 777216   ;;  %vm1090_vm3 = vcmask 769024   ;;  %s2163_s16 = sshll.u32 %s2678_s19, 2 }
   0xf   : > { %s219_s23 = scalar_lea.vmem %s2671_s0, %s2162_s20  ;;  %v2220_v12 = vpack.i.bf16 %v2103_v9, %v2102_v8  ;;  %v2225_v13 = vpack.i.bf16 %v2332_v11, %v2329_v10  ;;  %v264_v8 = vld [vmem:[%s2672_s1] sm:$0xf] }
  0x10   : > { %v2318_v5 = vld [vmem:[%s219_s23] sm:$0xff] }
  0x11   : > { %287 = vrot.lane.b32.xlu0 %v2318_v5, %s2257_s24  ;;  %v2324_v7 = vcombine.high %v2318_v5, %v2318_v5  ;;  %2221 = vrot.lane.b32.xlu1 %v2220_v12, %s2258_s25 }
  0x15   : > { %289 = vrot.lane.b32.xlu0 %v2324_v7, %s2257_s24  ;;  %2226 = vrot.lane.b32.xlu1 %v2225_v13, %s2260_s27 }
  0x19   : > { %2231 = vrot.lane.b32.xlu0 %v2220_v12, %s2259_s26  ;;  %2236 = vrot.lane.b32.xlu1 %v2225_v13, %s2261_s28 }
  0x83   : > { %v288_v14 = vpop.permute.xlu0 %287  ;;  %v2222_v18 = vpop.permute.xlu1 %2221 }
  0x84   : > { %v2344_v19 = vunpack.i.h.bf16 %v2222_v18  ;;  %v2346_v20 = vunpack.i.l.bf16 %v2222_v18  ;;  %v2353_v21 = vsel %vm291_vm4, 0.0, %v288_v14 }
  0x85   : > { %v298_v58 = vmul.f32 %v2329_v10, %v2353_v21 }
  0x86   : > { %v2357_v23 = vsel %vm477_vm5, %v2346_v20, %v2344_v19  ;;  %v482_v30 = vmul.f32 %v2346_v20, %v2353_v21 }
  0x87   : > { %v290_v15 = vpop.permute.xlu0 %289  ;;  %v2227_v22 = vpop.permute.xlu1 %2226 }
  0x88   : > { %v2339_v16 = vsel %vm291_vm4, %v288_v14, %v290_v15  ;;  %v2342_v17 = vsel %vm291_vm4, %v290_v15, 0.0  ;;  %v2359_v24 = vunpack.i.h.bf16 %v2227_v22  ;;  %v2361_v25 = vunpack.i.l.bf16 %v2227_v22 }
  0x89   : > { %306 = vrot.lane.b32.xlu1 %v2342_v17, %s2262_s29  ;;  %304 = vrot.lane.b32.xlu0 %v2339_v16, %s2262_s29  ;;  %v484_v26 = vmul.f32 %v2344_v19, %v2342_v17  ;;  %v483_v27 = vmul.f32 %v2357_v23, %v2339_v16  ;;  %v299_v57 = vmul.f32 %v2332_v11, %v2339_v16 }
  0x8a   : > { %v2371_v28 = vsel %vm583_vm6, %v2361_v25, %v2359_v24  ;;  %v588_v32 = vmul.f32 %v2361_v25, %v2353_v21  ;;  %v590_v33 = vmul.f32 %v2359_v24, %v2342_v17 }
  0x8b   : > { %v589_v29 = vmul.f32 %v2371_v28, %v2339_v16  ;;  %v2232_v31 = vpop.permute.xlu0 %2231  ;;  %v2237_v37 = vpop.permute.xlu1 %2236 }
  0x8c   : > { %v2385_v34 = vunpack.i.h.bf16 %v2232_v31  ;;  %v2387_v35 = vunpack.i.l.bf16 %v2232_v31  ;;  %v2401_v39 = vunpack.i.h.bf16 %v2237_v37  ;;  %v2403_v40 = vunpack.i.l.bf16 %v2237_v37  ;;  %v268_v37 = vld [vmem:[%s2672_s1 + $0x10] sm:$0xf] }
  0x8d   : > { %2241 = vrot.lane.b32.xlu1 %v2220_v12, %s2263_s30  ;;  %302 = vrot.lane.b32.xlu0 %v2353_v21, %s2262_s29 }
  0x8e   : > { %v2393_v36 = vsel %vm776_vm7, %v2387_v35, %v2385_v34  ;;  %v783_v41 = vmul.f32 %v2385_v34, %v2342_v17  ;;  %v781_v42 = vmul.f32 %v2387_v35, %v2353_v21  ;;  %v2414_v43 = vsel %vm880_vm8, %v2403_v40, %v2401_v39 }
  0x8f   : > { %v782_v38 = vmul.f32 %v2393_v36, %v2339_v16  ;;  %v886_v44 = vmul.f32 %v2414_v43, %v2339_v16  ;;  %v887_v45 = vmul.f32 %v2401_v39, %v2342_v17  ;;  %v885_v46 = vmul.f32 %v2403_v40, %v2353_v21 }
  0x91   : > { %492 = vrot.lane.b32.xlu1 %v484_v26, %s2264_s6  ;;  %490 = vrot.lane.b32.xlu0 %v483_v27, %s2264_s6 }
  0x95   : > { %596 = vrot.lane.b32.xlu1 %v589_v29, %s2265_s7  ;;  %488 = vrot.lane.b32.xlu0 %v482_v30, %s2264_s6  ;;  %v267_v29 = vld [vmem:[%s2672_s1 + $0xc] sm:$0xf] }
  0x99   : > { %594 = vrot.lane.b32.xlu1 %v588_v32, %s2265_s7  ;;  %598 = vrot.lane.b32.xlu0 %v590_v33, %s2265_s7 }
  0x9d   : > { %687 = vrot.lane.b32.xlu1 %v2342_v17, %s2266_s8  ;;  %685 = vrot.lane.b32.xlu0 %v2339_v16, %s2266_s8 }
  0xa1   : > { %683 = vrot.lane.b32.xlu0 %v2353_v21, %s2266_s8  ;;  %789 = vrot.lane.b32.xlu1 %v782_v38, %s2267_s9 }
  0xa5   : > { %791 = vrot.lane.b32.xlu0 %v783_v41, %s2267_s9  ;;  %787 = vrot.lane.b32.xlu1 %v781_v42, %s2267_s9 }
  0xa9   : > { %893 = vrot.lane.b32.xlu0 %v886_v44, %s2268_s10  ;;  %895 = vrot.lane.b32.xlu1 %v887_v45, %s2268_s10  ;;  %v269_v45 = vld [vmem:[%s2672_s1 + $0x14] sm:$0xf] }
  0xad   : > { %891 = vrot.lane.b32.xlu0 %v885_v46, %s2268_s10  ;;  %982 = vrot.lane.b32.xlu1 %v2339_v16, %s2269_s11 }
  0xb1   : > { %984 = vrot.lane.b32.xlu0 %v2342_v17, %s2269_s11  ;;  %980 = vrot.lane.b32.xlu1 %v2353_v21, %s2269_s11 }
  0xfb   : > { %v307_v47 = vpop.permute.xlu1 %306  ;;  %v305_v48 = vpop.permute.xlu0 %304 }
  0xfc   : > { %v310_v49 = vsel %vm308_vm9, %v305_v48, %v307_v47 }
  0xfd   : > { %2104 = vmatprep.subr.msk.mxu0 %vm315_vm10, %v310_v49 }
  0xff   : > { %v2242_v50 = vpop.permute.xlu1 %2241  ;;  %v303_v51 = vpop.permute.xlu0 %302 }
 0x100   : > { %v2438_v54 = vunpack.i.h.bf16 %v2242_v50  ;;  %v2440_v55 = vunpack.i.l.bf16 %v2242_v50  ;;  %v309_v56 = vsel %vm308_vm9, %v303_v51, %v305_v48  ;;  %v270_v51 = vld [vmem:[%s2672_s1 + $0x18] sm:$0xf] }
 0x101   : > { %2105 = vmatpush1.msk.msra.mxu0 %vm315_vm10, %v309_v56 }
 0x102   : > { %2106 = vmatmul.mubr.msk.f32.vlgmr.msra.gmra.mrb[0].mxu0 %vm311_vm11, %v265_v52  ;;  %2107 = vmatprep.subr.msk.mxu0 %vm315_vm10, %v299_v57  ;;  %v1080_v59 = vmul.f32 %v2438_v54, %v2342_v17  ;;  %v2454_v60 = vsel %vm1073_vm12, %v2440_v55, %v2438_v54  ;;  %v1078_v6 = vmul.f32 %v2440_v55, %v2353_v21  ;;  %v266_v17 = vld [vmem:[%s2672_s1 + $0x8] sm:$0xf] }
 0x103   : > { %v493_v61 = vpop.permute.xlu1 %492  ;;  %2108 = vmatpush1.msk.msra.mxu0 %vm315_vm10, %v298_v58  ;;  %v491_v62 = vpop.permute.xlu0 %490  ;;  %v1079_v63 = vmul.f32 %v2454_v60, %v2339_v16  ;;  %464 = vmatprep.mubr.f32.mxu0 %v2256_v1 }
 0x104   : > { %v496_v0 = vsel %vm494_vm13, %v491_v62, %v493_v61  ;;  %1088 = vrot.lane.b32.xlu1 %v1080_v59, %s2271_s14  ;;  %v272_v61 = vld [vmem:[%s2672_s1 + $0x20] sm:$0xf] }
 0x105   : > { %2110 = vmatprep.subr.msk.mxu0 %vm315_vm10, %v496_v0  ;;  %1086 = vrot.lane.b32.xlu0 %v1079_v63, %s2271_s14 }
 0x107   : > { %v597_v3 = vpop.permute.xlu1 %596  ;;  %v489_v4 = vpop.permute.xlu0 %488 }
 0x108   : > { %v495_v9 = vsel %vm494_vm13, %v489_v4, %v491_v62  ;;  %1175 = vperm.xlu1 %2245, %v282_v2  }
 0x109   : > { %1084 = vrot.lane.b32.xlu0 %v1078_v6, %s2271_s14 }
 0x10a   : > { %2109 = vmatmul.mubr.msk.f32.vlgmr.msra.gmra.mrb[0].mxu0 %vm311_vm11, %v264_v8 }
 0x10b   : > { %2111 = vmatpush1.msk.msra.mxu0 %vm315_vm10, %v495_v9  ;;  %v595_v12 = vpop.permute.xlu1 %594  ;;  %v599_v13 = vpop.permute.xlu0 %598  ;;  %568 = vmatprep.mubr.f32.mxu0 %v2256_v1 }
 0x10c   : > { %v602_v14 = vsel %vm600_vm14, %v597_v3, %v599_v13  ;;  %v601_v18 = vsel %vm600_vm14, %v595_v12, %v597_v3 }
 0x10d   : > { %2113 = vmatprep.subr.msk.mxu0 %vm315_vm10, %v602_v14 }
 0x10f   : > { %v688_v15 = vpop.permute.xlu1 %687  ;;  %v686_v16 = vpop.permute.xlu0 %685 }
 0x110   : > { %v691_v21 = vsel %vm689_vm15, %v686_v16, %v688_v15 }
 0x112   : > { %2112 = vmatmul.mubr.msk.f32.vlgmr.msra.gmra.mrb[0].mxu0 %vm311_vm11, %v266_v17 }
 0x113   : > { %2114 = vmatpush1.msk.msra.mxu0 %vm315_vm10, %v601_v18  ;;  %v684_v22 = vpop.permute.xlu0 %683  ;;  %674 = vmatprep.mubr.f32.mxu0 %v2256_v1  ;;  %v790_v26 = vpop.permute.xlu1 %789 }
 0x114   : > { %2116 = vmatprep.subr.msk.mxu0 %vm315_vm10, %v691_v21  ;;  %v690_v30 = vsel %vm689_vm15, %v684_v22, %v686_v16 }
 0x117   : > { %v792_v27 = vpop.permute.xlu0 %791  ;;  %v788_v31 = vpop.permute.xlu1 %787 }
 0x118   : > { %v795_v32 = vsel %vm793_vm0, %v790_v26, %v792_v27  ;;  %v794_v41 = vsel %vm793_vm0, %v788_v31, %v790_v26 }
 0x11a   : > { %2115 = vmatmul.mubr.msk.f32.vlgmr.msra.gmra.mrb[0].mxu0 %vm311_vm11, %v267_v29 }
 0x11b   : > { %2117 = vmatpush1.msk.msra.mxu0 %vm315_vm10, %v690_v30  ;;  %763 = vmatprep.mubr.f32.mxu0 %v2256_v1  ;;  %v894_v33 = vpop.permute.xlu0 %893  ;;  %v896_v38 = vpop.permute.xlu1 %895 }
 0x11c   : > { %2119 = vmatprep.subr.msk.mxu0 %vm315_vm10, %v795_v32  ;;  %v899_v44 = vsel %vm897_vm1, %v894_v33, %v896_v38 }
 0x11f   : > { %v892_v42 = vpop.permute.xlu0 %891  ;;  %v983_v47 = vpop.permute.xlu1 %982 }
 0x120   : > { %v898_v48 = vsel %vm897_vm1, %v892_v42, %v894_v33 }
 0x122   : > { %2118 = vmatmul.mubr.msk.f32.vlgmr.msra.gmra.mrb[0].mxu0 %vm311_vm11, %v268_v37 }
 0x123   : > { %2120 = vmatpush1.msk.msra.mxu0 %vm315_vm10, %v794_v41  ;;  %867 = vmatprep.mubr.f32.mxu0 %v2256_v1  ;;  %v985_v46 = vpop.permute.xlu0 %984  ;;  %v981_v50 = vpop.permute.xlu1 %980 }
 0x124   : > { %2122 = vmatprep.subr.msk.mxu0 %vm315_vm10, %v899_v44  ;;  %v988_v49 = vsel %vm986_vm2, %v983_v47, %v985_v46  ;;  %v987_v52 = vsel %vm986_vm2, %v981_v50, %v983_v47  ;;  %v275_v47 = vld [vmem:[%s2674_s3 + $0x8] sm:$0xf] }
 0x12a   : > { %2121 = vmatmul.mubr.msk.f32.vlgmr.msra.gmra.mrb[0].mxu0 %vm311_vm11, %v269_v45 }
 0x12b   : > { %2123 = vmatpush1.msk.msra.mxu0 %vm315_vm10, %v898_v48  ;;  %971 = vmatprep.mubr.f32.mxu0 %v2256_v1 }
 0x12c   : > { %2125 = vmatprep.subr.msk.mxu0 %vm315_vm10, %v988_v49 }
 0x132   : > { %2124 = vmatmul.mubr.msk.f32.vlgmr.msra.gmra.mrb[0].mxu0 %vm311_vm11, %v270_v51 }
 0x133   : > { %2126 = vmatpush1.msk.msra.mxu0 %vm315_vm10, %v987_v52  ;;  %1060 = vmatprep.mubr.f32.mxu0 %v2256_v1 }
 0x13a   : > { %2127 = vmatmul.mubr.msk.f32.vlgmr.msra.gmra.mrb[0].mxu0 %vm311_vm11, %v271_v53  ;;  %v276_v53 = vld [vmem:[%s2674_s3 + $0xc] sm:$0xf] }
 0x13b   : > { %1164 = vmatprep.mubr.f32.mxu0 %v2256_v1 }
 0x176   : > { %v1089_v56 = vpop.permute.xlu1 %1088 }
 0x177   : > { %v1087_v57 = vpop.permute.xlu0 %1086 }
 0x178   : > { %v1092_v58 = vsel %vm1090_vm3, %v1087_v57, %v1089_v56 }
 0x179   : > { %2128 = vmatprep.subr.msk.mxu0 %vm315_vm10, %v1092_v58 }
 0x17b   : > { %v1085_v59 = vpop.permute.xlu0 %1084 }
 0x17c   : > { %v1091_v62 = vsel %vm1090_vm3, %v1085_v59, %v1087_v57 }
 0x17d   : > { %2129 = vmatpush1.msk.msra.mxu0 %vm315_vm10, %v1091_v62  ;;  %v277_v62 = vld [vmem:[%s2674_s3 + $0x10] sm:$0xf] }
 0x17e   : > { %2130 = vmatmul.mubr.msk.f32.vlgmr.msra.gmra.mrb[0].mxu0 %vm311_vm11, %v272_v61 }
 0x187   : > { %v1176_v63 = vpop.permute.xlu1 %1175 }
 0x251   : > { %v1166_v0 = vpop.f32.mrb[0].mxu0 }
 0x252   : > { %v1178_v2 = vadd.f32 %v1176_v63, %v1166_v0  ;;  %v1168_v3 = vpop.f32.mrb[1].mxu0 }
 0x253   : > { %v1179_v4 = vadd.f32 %v1176_v63, %v1168_v3 }
 0x254   : > { %v1180_v6 = vmax.f32 %v1178_v2, 0.0 }
 0x255   : > { %v1181_v8 = vmax.f32 %v1179_v4, 0.0  ;;  %v278_v4 = vld [vmem:[%s2674_s3 + $0x14] sm:$0xf] }
 0x256   : > { %1184 = vrot.lane.b32.xlu0 %v1180_v6, %s2257_s24 }
 0x257   : > { %1186 = vrot.lane.b32.xlu1 %v1181_v8, %s2257_s24  ;;  %s224_s24 = scalar_lea.vmem %s2676_s5, %s2163_s16 }
 0x2c8   : > { %v1185_v9 = vpop.permute.xlu0 %1184 }
 0x2c9   : > { %v1187_v12 = vpop.permute.xlu1 %1186  ;;  %v1192_v16 = vsel %vm291_vm4, 0.0, %v1185_v9 }
 0x2ca   : > { %v1188_v13 = vsel %vm291_vm4, %v1185_v9, %v1187_v12  ;;  %v1193_v14 = vsel %vm291_vm4, %v1187_v12, 0.0  ;;  %v1364_v18 = vmul.f32 %v2346_v20, %v1192_v16  ;;  %v1734_v26 = vmul.f32 %v2403_v40, %v1192_v16 }
 0x2cb   : > { %1202 = vrot.lane.b32.xlu1 %v1193_v14, %s2262_s29  ;;  %1200 = vrot.lane.b32.xlu0 %v1188_v13, %s2262_s29  ;;  %v1365_v15 = vmul.f32 %v1188_v13, %v2357_v23  ;;  %v1366_v17 = vmul.f32 %v2344_v19, %v1193_v14  ;;  %v1459_v21 = vmul.f32 %v1188_v13, %v2371_v28 }
 0x2cc   : > { %v1460_v22 = vmul.f32 %v2359_v24, %v1193_v14  ;;  %v1458_v23 = vmul.f32 %v2361_v25, %v1192_v16  ;;  %v1641_v19 = vmul.f32 %v1188_v13, %v2393_v36  ;;  %v1642_v20 = vmul.f32 %v2385_v34, %v1193_v14 }
 0x2cd   : > { %v1640_v24 = vmul.f32 %v2387_v35, %v1192_v16  ;;  %v1735_v25 = vmul.f32 %v1188_v13, %v2414_v43  ;;  %v1736_v28 = vmul.f32 %v2401_v39, %v1193_v14  ;;  %v1917_v34 = vmul.f32 %v1188_v13, %v2454_v60  ;;  %v283_v39 = vld [vmem:[%s2675_s4] sm:$0xf] }
 0x2ce   : > { %v1918_v35 = vmul.f32 %v2438_v54, %v1193_v14  ;;  %v1916_v36 = vmul.f32 %v2440_v55, %v1192_v16  ;;  %v274_v54 = vld [vmem:[%s2674_s3 + $0x4] sm:$0xf]  ;;  %v1195_v30 = vmul.f32 %v2332_v11, %v1188_v13  ;;  %v1194_v31 = vmul.f32 %v2329_v10, %v1192_v16  ;;  %v273_v10 = vld [vmem:[%s2674_s3] sm:$0xf] }
 0x2cf   : > { %1198 = vrot.lane.b32.xlu0 %v1192_v16, %s2262_s29  ;;  %1372 = vrot.lane.b32.xlu1 %v1365_v15, %s2264_s6 }
 0x2d3   : > { %1374 = vrot.lane.b32.xlu0 %v1366_v17, %s2264_s6  ;;  %1370 = vrot.lane.b32.xlu1 %v1364_v18, %s2264_s6 }
 0x2d7   : > { %1466 = vrot.lane.b32.xlu0 %v1459_v21, %s2265_s7  ;;  %1468 = vrot.lane.b32.xlu1 %v1460_v22, %s2265_s7  ;;  %v280_v21 = vld [vmem:[%s2674_s3 + $0x1c] sm:$0xf] }
 0x2db   : > { %1464 = vrot.lane.b32.xlu0 %v1458_v23, %s2265_s7  ;;  %1554 = vrot.lane.b32.xlu1 %v1188_v13, %s2266_s8  ;;  %v281_v23 = vld [vmem:[%s2674_s3 + $0x20] sm:$0xf] }
 0x2df   : > { %1556 = vrot.lane.b32.xlu0 %v1193_v14, %s2266_s8  ;;  %1552 = vrot.lane.b32.xlu1 %v1192_v16, %s2266_s8 }
 0x2e3   : > { %1648 = vrot.lane.b32.xlu0 %v1641_v19, %s2267_s9  ;;  %1650 = vrot.lane.b32.xlu1 %v1642_v20, %s2267_s9 }
 0x2e7   : > { %1646 = vrot.lane.b32.xlu0 %v1640_v24, %s2267_s9  ;;  %1742 = vrot.lane.b32.xlu1 %v1735_v25, %s2268_s10 }
 0x2eb   : > { %1744 = vrot.lane.b32.xlu0 %v1736_v28, %s2268_s10  ;;  %1740 = vrot.lane.b32.xlu1 %v1734_v26, %s2268_s10 }
 0x2ef   : > { %1830 = vrot.lane.b32.xlu0 %v1188_v13, %s2269_s11  ;;  %1832 = vrot.lane.b32.xlu1 %v1193_v14, %s2269_s11  ;;  %v279_v13 = vld [vmem:[%s2674_s3 + $0x18] sm:$0xf] }
 0x2f3   : > { %1828 = vrot.lane.b32.xlu0 %v1192_v16, %s2269_s11  ;;  %1924 = vrot.lane.b32.xlu1 %v1917_v34, %s2271_s14 }
 0x2f7   : > { %1926 = vrot.lane.b32.xlu0 %v1918_v35, %s2271_s14  ;;  %1922 = vrot.lane.b32.xlu1 %v1916_v36, %s2271_s14 }
 0x2fb   : > { %2012 = vperm.xlu0 %2246, %v283_v39  }
 0x33d   : > { %v1203_v40 = vpop.permute.xlu1 %1202  ;;  %v1201_v43 = vpop.permute.xlu0 %1200 }
 0x33e   : > { %v1205_v60 = vsel %vm308_vm9, %v1201_v43, %v1203_v40 }
 0x33f   : > { %2131 = vmatprep.subr.msk.mxu1 %vm315_vm10, %v1205_v60 }
 0x341   : > { %v1199_v27 = vpop.permute.xlu0 %1198  ;;  %v1373_v29 = vpop.permute.xlu1 %1372 }
 0x342   : > { %v1204_v55 = vsel %vm308_vm9, %v1199_v27, %v1201_v43 }
 0x343   : > { %2132 = vmatpush1.msk.msra.mxu1 %vm315_vm10, %v1204_v55 }
 0x344   : > { %2133 = vmatmul.mubr.msk.f32.vlgmr.msra.gmra.mrb[0].mxu1 %vm311_vm11, %v274_v54  ;;  %2134 = vmatprep.subr.msk.mxu1 %vm315_vm10, %v1195_v30 }
 0x345   : > { %v1375_v32 = vpop.permute.xlu0 %1374  ;;  %v1371_v33 = vpop.permute.xlu1 %1370  ;;  %2135 = vmatpush1.msk.msra.mxu1 %vm315_vm10, %v1194_v31  ;;  %1357 = vmatprep.mubr.f32.mxu1 %v2256_v1 }
 0x346   : > { %v1377_v37 = vsel %vm494_vm13, %v1373_v29, %v1375_v32  ;;  %v1376_v41 = vsel %vm494_vm13, %v1371_v33, %v1373_v29 }
 0x347   : > { %2137 = vmatprep.subr.msk.mxu1 %vm315_vm10, %v1377_v37 }
 0x349   : > { %v1467_v38 = vpop.permute.xlu0 %1466  ;;  %v1469_v11 = vpop.permute.xlu1 %1468 }
 0x34a   : > { %v1471_v42 = vsel %vm600_vm14, %v1467_v38, %v1469_v11 }
 0x34c   : > { %2136 = vmatmul.mubr.msk.f32.vlgmr.msra.gmra.mrb[0].mxu1 %vm311_vm11, %v273_v10 }
 0x34d   : > { %2138 = vmatpush1.msk.msra.mxu1 %vm315_vm10, %v1376_v41  ;;  %v1465_v44 = vpop.permute.xlu0 %1464  ;;  %v1555_v45 = vpop.permute.xlu1 %1554  ;;  %1449 = vmatprep.mubr.f32.mxu1 %v2256_v1 }
 0x34e   : > { %2140 = vmatprep.subr.msk.mxu1 %vm315_vm10, %v1471_v42  ;;  %v1470_v49 = vsel %vm600_vm14, %v1465_v44, %v1467_v38 }
 0x351   : > { %v1557_v46 = vpop.permute.xlu0 %1556  ;;  %v1553_v48 = vpop.permute.xlu1 %1552 }
 0x352   : > { %v1559_v50 = vsel %vm689_vm15, %v1555_v45, %v1557_v46  ;;  %v1558_v57 = vsel %vm689_vm15, %v1553_v48, %v1555_v45 }
 0x354   : > { %2139 = vmatmul.mubr.msk.f32.vlgmr.msra.gmra.mrb[0].mxu1 %vm311_vm11, %v275_v47 }
 0x355   : > { %2141 = vmatpush1.msk.msra.mxu1 %vm315_vm10, %v1470_v49  ;;  %v1649_v51 = vpop.permute.xlu0 %1648  ;;  %1543 = vmatprep.mubr.f32.mxu1 %v2256_v1  ;;  %v1651_v52 = vpop.permute.xlu1 %1650 }
 0x356   : > { %2143 = vmatprep.subr.msk.mxu1 %vm315_vm10, %v1559_v50  ;;  %v1653_v58 = vsel %vm793_vm0, %v1649_v51, %v1651_v52 }
 0x359   : > { %v1647_v56 = vpop.permute.xlu0 %1646  ;;  %v1743_v59 = vpop.permute.xlu1 %1742 }
 0x35a   : > { %v1652_v63 = vsel %vm793_vm0, %v1647_v56, %v1649_v51 }
 0x35c   : > { %2142 = vmatmul.mubr.msk.f32.vlgmr.msra.gmra.mrb[0].mxu1 %vm311_vm11, %v276_v53 }
 0x35d   : > { %2144 = vmatpush1.msk.msra.mxu1 %vm315_vm10, %v1558_v57  ;;  %1631 = vmatprep.mubr.f32.mxu1 %v2256_v1  ;;  %v1745_v61 = vpop.permute.xlu0 %1744  ;;  %v1741_v0 = vpop.permute.xlu1 %1740 }
 0x35e   : > { %2146 = vmatprep.subr.msk.mxu1 %vm315_vm10, %v1653_v58  ;;  %v1747_v2 = vsel %vm897_vm1, %v1743_v59, %v1745_v61  ;;  %v1746_v8 = vsel %vm897_vm1, %v1741_v0, %v1743_v59 }
 0x361   : > { %v1831_v3 = vpop.permute.xlu0 %1830  ;;  %v1833_v6 = vpop.permute.xlu1 %1832 }
 0x362   : > { %v1835_v12 = vsel %vm986_vm2, %v1831_v3, %v1833_v6 }
 0x364   : > { %2145 = vmatmul.mubr.msk.f32.vlgmr.msra.gmra.mrb[0].mxu1 %vm311_vm11, %v277_v62 }
 0x365   : > { %2147 = vmatpush1.msk.msra.mxu1 %vm315_vm10, %v1652_v63  ;;  %1725 = vmatprep.mubr.f32.mxu1 %v2256_v1  ;;  %v1829_v9 = vpop.permute.xlu0 %1828  ;;  %v1925_v15 = vpop.permute.xlu1 %1924 }
 0x366   : > { %2149 = vmatprep.subr.msk.mxu1 %vm315_vm10, %v1747_v2  ;;  %v1834_v16 = vsel %vm986_vm2, %v1829_v9, %v1831_v3 }
 0x369   : > { %v1927_v14 = vpop.permute.xlu0 %1926  ;;  %v1923_v18 = vpop.permute.xlu1 %1922 }
 0x36a   : > { %v1929_v17 = vsel %vm1090_vm3, %v1925_v15, %v1927_v14  ;;  %v1928_v22 = vsel %vm1090_vm3, %v1923_v18, %v1925_v15 }
 0x36c   : > { %2148 = vmatmul.mubr.msk.f32.vlgmr.msra.gmra.mrb[0].mxu1 %vm311_vm11, %v278_v4 }
 0x36d   : > { %2150 = vmatpush1.msk.msra.mxu1 %vm315_vm10, %v1746_v8  ;;  %1819 = vmatprep.mubr.f32.mxu1 %v2256_v1 }
 0x36e   : > { %2152 = vmatprep.subr.msk.mxu1 %vm315_vm10, %v1835_v12 }
 0x374   : > { %2151 = vmatmul.mubr.msk.f32.vlgmr.msra.gmra.mrb[0].mxu1 %vm311_vm11, %v279_v13 }
 0x375   : > { %2153 = vmatpush1.msk.msra.mxu1 %vm315_vm10, %v1834_v16  ;;  %1907 = vmatprep.mubr.f32.mxu1 %v2256_v1 }
 0x376   : > { %2155 = vmatprep.subr.msk.mxu1 %vm315_vm10, %v1929_v17 }
 0x37a   : > { %v2013_v19 = vpop.permute.xlu0 %2012 }
 0x37c   : > { %2154 = vmatmul.mubr.msk.f32.vlgmr.msra.gmra.mrb[0].mxu1 %vm311_vm11, %v280_v21 }
 0x37d   : > { %2156 = vmatpush1.msk.msra.mxu1 %vm315_vm10, %v1928_v22  ;;  %2001 = vmatprep.mubr.f32.mxu1 %v2256_v1 }
 0x384   : > { %2157 = vmatmul.mubr.msk.f32.vlgmr.msra.gmra.mrb[0].mxu1 %vm311_vm11, %v281_v23 }
 0x457   : > { %v2003_v20 = vpop.f32.mrb[0].mxu1 }
 0x458   : > { %v2015_v24 = vadd.f32 %v2013_v19, %v2003_v20  ;;  %v2005_v25 = vpop.f32.mrb[1].mxu1 }
 0x459   : > { %v2016_v28 = vadd.f32 %v2013_v19, %v2005_v25 }
 0x45a   : > { %v2018_v26 = vadd.f32 %v2015_v24, %v2318_v5 }
 0x45b   : > { %v2019_v34 = vadd.f32 %v2016_v28, %v2324_v7 }
 0x45c   : > { %v2020_v35 = vmax.f32 %v2018_v26, 0.0 }
 0x45d   : > { %v2021_v36 = vmax.f32 %v2019_v34, 0.0 }
 0x45f   : > { %v2158_v1 = vpack.c.bf16 %v2021_v36, %v2020_v35 }
 0x461   : > { %2159 = vst.sshfl [vmem:[%s224_s24] sm:$0x33 pattern:$0x76325410] %v2158_v1 }
 0x462 PF: > { %s15_s18 = sadd.s32 1, %s2254_s18  }
 0x463   : > { %p12_p4 = scmp.ge.s32.totalorder %s15_s18, 4  }
 0x465   :  { %14 = sbr.rel (!%p12_p4) target bundleno = 1 (0x1), region = 70 }

</bundles_post_ra>
